<compile_context>
chip_gen: v6e
topology: v6e:2x2x1
jax: 0.10.0
libtpu: 0.0.40
codegen_flags: <defaults>
</compile_context>

<pallas_src>
import jax
import jax.numpy as jnp
from jax.experimental import pallas as pl
from jax.experimental.pallas import tpu as pltpu

# Deterministic "tau_config" (synthetic, no checkpoint load):
TAU_INIT = 0.5            # tau_config.init  -> initial value of nn.Parameter tau_
TAU_REQUIRES_GRAD = True  # tau_config.requires_grad (irrelevant for forward)
TAU_TRAIN_SCALE = 10.0    # tau_config.train_scale

# Tile geometry: 512 rows x 1024 lanes x 4 B = 2 MiB per tile.
LANES = 1024        # lane-dense last dim, large multiple of 128
BLOCK_ROWS = 512    # multiple of 8 (sublane)


def _sim_scale_kernel(scale_ref, grad_ref, out_ref):
    """out = grad * (tau * tau_train_scale).  Pure elementwise, VPU-bound."""
    out_ref[...] = grad_ref[...] * scale_ref[0]


def similarity_term_forward(grad_val, tau, *, lanes=LANES, block_rows=BLOCK_ROWS):
    """Pallas implementation of SimilarityTerm.forward's concrete part.

    grad_val : arbitrary-shaped float array -- output of the (abstract) grad()
    tau      : scalar                       -- the nn.Parameter tau_
    returns  : same shape/dtype as grad_val == grad_val * tau * TAU_TRAIN_SCALE
    """
    orig_shape = grad_val.shape
    dtype = grad_val.dtype
    total = int(grad_val.size)

    # Lane-dense flatten, independent of the spatial dims.
    rows = pl.cdiv(total, lanes)
    block_r = min(block_rows, ((rows + 7) // 8) * 8)   # multiple of 8, <= block_rows
    padded_rows = pl.cdiv(rows, block_r) * block_r
    padded_total = padded_rows * lanes

    flat = grad_val.reshape(-1)
    if padded_total != total:
        flat = jnp.pad(flat, (0, padded_total - total))
    g2 = flat.reshape(padded_rows, lanes)

    # Fold tau * tau_train_scale into one SMEM scalar on the host.
    scale_arr = jnp.reshape(jnp.asarray(tau, dtype) * jnp.asarray(TAU_TRAIN_SCALE, dtype), (1,))

    num_blocks = padded_rows // block_r

    out2 = pl.pallas_call(
        _sim_scale_kernel,
        out_shape=jax.ShapeDtypeStruct(g2.shape, dtype),
        grid=(num_blocks,),
        in_specs=[
            pl.BlockSpec(memory_space=pltpu.MemorySpace.SMEM),           # scale scalar
            pl.BlockSpec((block_r, lanes), lambda i: (i, 0)),            # grad tile
        ],
        out_specs=pl.BlockSpec((block_r, lanes), lambda i: (i, 0)),
        input_output_aliases={1: 0},                                     # scale in place
        compiler_params=pltpu.CompilerParams(
            dimension_semantics=("parallel",),
        ),
    )(scale_arr, g2)

    out_flat = out2.reshape(-1)
    if padded_total != total:
        out_flat = out_flat[:total]
    return out_flat.reshape(orig_shape)


if __name__ == "__main__":
    key = jax.random.PRNGKey(0)
    k1, k2, k3, k4 = jax.random.split(key, 4)

    # Small shapes consistent with a registration similarity term:
    N, C, H, W = 2, 4, 16, 16
    tar = jax.random.normal(k1, (N, C, H, W), dtype=jnp.float32)
    warped_src = jax.random.normal(k2, (N, C, H, W), dtype=jnp.float32)
    disp = jax.random.normal(k3, (N, 2, H, W), dtype=jnp.float32)

    # TODO(synk): SimilarityTerm.grad() is abstract in the base class (subclasses
    # define it); a deterministic stand-in tensor (shaped like disp, as a
    # displacement-field gradient would be) is used as its output here.
    grad_val = jax.random.normal(k4, disp.shape, dtype=jnp.float32)

    # nn.Parameter(torch.tensor(tau_config.init)) -> scalar parameter, init deterministically.
    tau = jnp.asarray(TAU_INIT, dtype=jnp.float32)

    out = similarity_term_forward(grad_val, tau)
    out = jax.block_until_ready(out)

    ref = grad_val * TAU_INIT * TAU_TRAIN_SCALE
    assert out.shape == grad_val.shape and out.dtype == grad_val.dtype
    assert jnp.allclose(out, ref, atol=1e-5), "Pallas kernel mismatch vs reference"

    print("KERNEL_OK")
</pallas_src>

<mosaic_0001>
module attributes {stable_mosaic.version = 11 : i64} {
  func.func @_sim_scale_kernel(%arg0: i32, %arg1: memref<1xf32, #tpu.memory_space<smem>>, %arg2: memref<8x1024xf32, #tpu.memory_space<vmem>>, %arg3: memref<8x1024xf32, #tpu.memory_space<vmem>>) attributes {dimension_semantics = [#tpu.dimension_semantics<parallel>], iteration_bounds = array<i64: 1>, scalar_prefetch = 0 : i64, scratch_operands = 0 : i64, tpu.core_type = #tpu.core_type<tc>, window_params = [{transform_indices = @transform_0, window_bounds = array<i64: 1>}, {transform_indices = @transform_1, window_bounds = array<i64: 8, 1024>}, {transform_indices = @transform_2, window_bounds = array<i64: 8, 1024>}]} {
    %c0 = arith.constant 0 : index
    %c0_0 = arith.constant 0 : index
    %0 = vector.load %arg2[%c0, %c0_0] : memref<8x1024xf32, #tpu.memory_space<vmem>>, vector<8x1024xf32>
    %c0_1 = arith.constant 0 : index
    %1 = memref.load %arg1[%c0_1] : memref<1xf32, #tpu.memory_space<smem>>
    %2 = vector.broadcast %1 : f32 to vector<8x1024xf32>
    %3 = arith.mulf %0, %2 : vector<8x1024xf32>
    %c0_2 = arith.constant 0 : index
    %c0_3 = arith.constant 0 : index
    %4 = vector.load %arg3[%c0_2, %c0_3] : memref<8x1024xf32, #tpu.memory_space<vmem>>, vector<8x1024xf32>
    tpu.vector_store %arg3[%c0_2, %c0_3], %3 {strides = array<i32>} : memref<8x1024xf32, #tpu.memory_space<vmem>>, vector<8x1024xf32>,
    return
  }
  func.func @transform_0(%arg0: i32) -> i32 {
    %c0_i32 = arith.constant 0 : i32
    %c0_i32_0 = arith.constant 0 : i32
    return %c0_i32 : i32
  }
  func.func @transform_1(%arg0: i32) -> (i32, i32) {
    %c0_i32 = arith.constant 0 : i32
    %c0_i32_0 = arith.constant 0 : i32
    return %arg0, %c0_i32 : i32, i32
  }
  func.func @transform_2(%arg0: i32) -> (i32, i32) {
    %c0_i32 = arith.constant 0 : i32
    %c0_i32_0 = arith.constant 0 : i32
    return %arg0, %c0_i32 : i32, i32
  }
}

</mosaic_0001>

<bundles_post_ra>
// kernel: tpu_custom_call.1
= control target key start
LH: loop header
LB: loop body
LE: loop exit
PB: predicated region body
PF: predicated region fallthrough
CT: control target
= control target key end

     0   :  { %8 = vsyncpa [#allocation4], 0  ;;  %s138_s0 = inlined_call_operand.<no memory space> [shape: f32[1], index: 0, kind: input, shape index: {}]   ;;  %s139_s1 = inlined_call_operand.hbm [shape: f32[8,1024], index: 1, kind: input, shape index: {}, may-alias: {1,2}]   ;;  %s140_s2 = inlined_call_operand.hbm [shape: f32[8,1024], index: 2, kind: output, shape index: {}, may-alias: {1,2}]  }
   0x1   :  { %9 = vsyncpa [#allocation5], 0  ;;  %s112_s9 = smov [#allocation3]  }
   0x2   :  { %s18_s10 = sshll.u32 %s112_s9, 4  ;;  %s19_s10 = int_to_ptr.vmem [resolvable:$true] %s18_s10 }
   0x3   :  { %s76_s11 = scalar_lea.vmem %s19_s10, 1024  ;;  %p81_p1 = scmp.lt.s32.totalorder %s19_s10, %s19_s10 }
   0x4   :  { %p77_p0 = scmp.ne.s32.totalorder %s19_s10, %s76_s11  ;;  %p82_p2 = scmp.lt.s32.totalorder %s76_s11, %s76_s11 }
   0x6   :  { %p83_p3 = por %p82_p2, %p81_p1 }
   0x8   :  { %p84_p4 = pnand %p83_p3, %p77_p0 }
   0xa   :  { %87 = shalt.err (!%p84_p4)
}
   0xb   :  { %21 = dma.hbm_to_vmem [thread:$0]  %s139_s1, 1024, %s19_s10, [#allocation4]  }
   0xc   :  { %108 = dma.done.wait [#allocation4], 1024  }
   0xd   :  { %109 = vsyncadd [#allocation4], 4294966272  ;;  %v34_v0 = vstv %s138_s0  ;;  %v25_v1 = vld [vmem:[#allocation3] sm:$0xff]  ;;  %v26_v2 = vld [vmem:[#allocation3 + $0x8] sm:$0xff]  ;;  %s113_s16 = smov [#allocation6]  }
   0xe   :  { %v27_v3 = vld [vmem:[#allocation3 + $0x10] sm:$0xff]  ;;  %s57_s17 = sshll.u32 %s113_s16, 4  ;;  %v35_v4 = vmul.f32 %v34_v0, %v25_v1  ;;  %v36_v5 = vmul.f32 %v34_v0, %v26_v2  ;;  %v28_v7 = vld [vmem:[#allocation3 + $0x18] sm:$0xff]  ;;  %v29_v8 = vld [vmem:[#allocation3 + $0x20] sm:$0xff]  ;;  %s58_s17 = int_to_ptr.vmem [resolvable:$true] %s57_s17 }
   0xf   :  { %v37_v6 = vmul.f32 %v34_v0, %v27_v3  ;;  %v30_v9 = vld [vmem:[#allocation3 + $0x28] sm:$0xff]  ;;  %v38_v10 = vmul.f32 %v34_v0, %v28_v7  ;;  %v39_v11 = vmul.f32 %v34_v0, %v29_v8  ;;  %v31_v13 = vld [vmem:[#allocation3 + $0x30] sm:$0xff]  ;;  %v32_v14 = vld [vmem:[#allocation3 + $0x38] sm:$0xff]  ;;  %s88_s0 = scalar_lea.vmem %s58_s17, 1024  ;;  %p93_p6 = scmp.lt.s32.totalorder %s58_s17, %s58_s17 }
  0x10   :  { %v40_v12 = vmul.f32 %v34_v0, %v30_v9  ;;  %43 = vst [vmem:[#allocation6] sm:$0xff] %v35_v4  ;;  %44 = vst [vmem:[#allocation6 + $0x8] sm:$0xff] %v36_v5  ;;  %v41_v15 = vmul.f32 %v34_v0, %v31_v13  ;;  %v42_v16 = vmul.f32 %v34_v0, %v32_v14  ;;  %p89_p5 = scmp.ne.s32.totalorder %s58_s17, %s88_s0  ;;  %p94_p7 = scmp.lt.s32.totalorder %s88_s0, %s88_s0 }
  0x11   :  { %45 = vst [vmem:[#allocation6 + $0x10] sm:$0xff] %v37_v6  ;;  %46 = vst [vmem:[#allocation6 + $0x18] sm:$0xff] %v38_v10 }
  0x12   :  { %47 = vst [vmem:[#allocation6 + $0x20] sm:$0xff] %v39_v11  ;;  %48 = vst [vmem:[#allocation6 + $0x28] sm:$0xff] %v40_v12  ;;  %p95_p8 = por %p94_p7, %p93_p6 }
  0x13   :  { %49 = vst [vmem:[#allocation6 + $0x30] sm:$0xff] %v41_v15  ;;  %50 = vst [vmem:[#allocation6 + $0x38] sm:$0xff] %v42_v16 }
  0x14   :  { %p96_p9 = pnand %p95_p8, %p89_p5 }
  0x16   :  { %99 = shalt.err (!%p96_p9)
}
  0x17   :  { %60 = dma.vmem_to_hbm [thread:$0]  %s58_s17, 1024, %s140_s2, [#allocation5]  }
  0x18   :  { %110 = dma.done.wait [#allocation5], 1024  }
  0x19   :  { %111 = vsyncadd [#allocation5], 4294966272 }
  0x1a   :  { %64 = vsyncpa [#allocation4], 1 }
  0x1b   :  { %65 = vsyncpa [#allocation5], 1 }

</bundles_post_ra>
